<compile_context>
chip_gen: v7x
topology: tpu7x:2x2x1
jax: 0.10.0
libtpu: 0.0.40
codegen_flags: <defaults>
</compile_context>

<pallas_src>
import functools

import jax
import jax.numpy as jnp
from jax import lax
from jax.experimental import pallas as pl
from jax.experimental.pallas import tpu as pltpu

_INV_SQRT2 = 0.7071067811865476


def _gelu_f32(h):
    # Exact GELU (erf formulation) = PyTorch nn.GELU() default, in f32.
    return 0.5 * h * (1.0 + lax.erf(h * _INV_SQRT2))


def _ffn_kernel_single(x_ref, w1_ref, b1_ref, w2_ref, b2_ref, o_ref):
    # Hidden dim fits in one VMEM block: no accumulator, no reduction grid axis.
    h = jnp.dot(x_ref[...], w1_ref[...], preferred_element_type=jnp.float32)
    h = _gelu_f32(h + b1_ref[...].astype(jnp.float32))
    y = jnp.dot(h.astype(w2_ref.dtype), w2_ref[...], preferred_element_type=jnp.float32)
    o_ref[...] = (y + b2_ref[...].astype(jnp.float32)).astype(o_ref.dtype)


def _ffn_kernel_blocked(x_ref, w1_ref, b1_ref, w2_ref, b2_ref, o_ref, acc_ref):
    h_idx = pl.program_id(1)

    @pl.when(h_idx == 0)
    def _init():
        acc_ref[...] = jnp.zeros_like(acc_ref)

    # First linear partial: (TM, dim) @ (dim, TH) on the MXU, f32 accumulate.
    h = jnp.dot(x_ref[...], w1_ref[...], preferred_element_type=jnp.float32)
    # Disjoint b1 slice per hidden block -> no double counting; GELU in f32.
    h = _gelu_f32(h + b1_ref[...].astype(jnp.float32))

    # Second linear partial: (TM, TH) @ (TH, dim), accumulated over hidden blocks.
    acc_ref[...] += jnp.dot(h.astype(w2_ref.dtype), w2_ref[...],
                            preferred_element_type=jnp.float32)

    @pl.when(h_idx == pl.num_programs(1) - 1)
    def _finalize():
        o_ref[...] = (acc_ref[...] + b2_ref[...].astype(jnp.float32)).astype(o_ref.dtype)


def _round_up(x, m):
    return ((x + m - 1) // m) * m


@functools.partial(jax.jit, static_argnames=("tile_m", "tile_h", "use_bf16"))
def feed_forward(x, w1, b1, w2, b2, *, tile_m=256, tile_h=512, use_bf16=True):
    """x: (batch, seq, dim). w1: (dim, hidden), b1: (hidden,), w2: (hidden, dim), b2: (dim,)."""
    batch, seq, dim = x.shape
    hidden = w1.shape[1]
    out_dtype = x.dtype

    compute_dtype = jnp.bfloat16 if use_bf16 else x.dtype
    row_align = 16 if compute_dtype == jnp.bfloat16 else 8

    x2d = x.reshape(batch * seq, dim).astype(compute_dtype)
    w1c = w1.astype(compute_dtype)
    w2c = w2.astype(compute_dtype)
    b1_2d = b1.reshape(1, hidden).astype(jnp.float32)
    b2_2d = b2.reshape(1, dim).astype(jnp.float32)

    m = x2d.shape[0]

    # Row tiling: large tiles for MXU utilization, clamped for tiny inputs.
    tm = min(_round_up(tile_m, row_align), _round_up(m, row_align))
    m_pad = _round_up(m, tm)
    if m_pad != m:
        # TODO(synk): for production shapes prefer m % tile_m == 0 to avoid this extra HBM copy.
        x2d = jnp.pad(x2d, ((0, m_pad - m), (0, 0)))

    # Hidden tiling: stream weights through VMEM only when the hidden dim is large
    # enough to be cleanly blocked; otherwise keep it resident (single-block fast path).
    if hidden % tile_h == 0 and tile_h % 128 == 0 and tile_h < hidden:
        th = tile_h
    else:
        th = hidden
    num_h = hidden // th

    # VMEM working set (double-buffered pipelined blocks + f32 accumulator) + headroom.
    in_b = jnp.dtype(compute_dtype).itemsize
    out_b = jnp.dtype(out_dtype).itemsize
    need = (2 * tm * dim * in_b          # x tile
            + 2 * dim * th * in_b        # W1 block
            + 2 * th * dim * in_b        # W2 block
            + 2 * (th + dim) * 4         # biases
            + 2 * tm * dim * out_b       # out tile
            + tm * dim * 4               # accumulator (blocked path only; small)
            + tm * th * 4)               # GELU intermediate
    vmem_limit = int(min(max(2 * need + (4 << 20), 16 << 20), 64 << 20))

    if num_h == 1:
        grid_spec = pltpu.PrefetchScalarGridSpec(
            num_scalar_prefetch=0,
            grid=(m_pad // tm,),
            in_specs=[
                pl.BlockSpec((tm, dim), lambda i: (i, 0)),      # x row-tile
                pl.BlockSpec((dim, hidden), lambda i: (0, 0)),  # W1 (resident)
                pl.BlockSpec((1, hidden), lambda i: (0, 0)),    # b1
                pl.BlockSpec((hidden, dim), lambda i: (0, 0)),  # W2 (resident)
                pl.BlockSpec((1, dim), lambda i: (0, 0)),       # b2
            ],
            out_specs=pl.BlockSpec((tm, dim), lambda i: (i, 0)),
            scratch_shapes=[],
        )
        kernel = _ffn_kernel_single
        dim_sem = ("parallel",)
    else:
        grid_spec = pltpu.PrefetchScalarGridSpec(
            num_scalar_prefetch=0,
            grid=(m_pad // tm, num_h),
            in_specs=[
                pl.BlockSpec((tm, dim), lambda i, h: (i, 0)),   # x row-tile (constant over h)
                pl.BlockSpec((dim, th), lambda i, h: (0, h)),   # W1 hidden-block
                pl.BlockSpec((1, th), lambda i, h: (0, h)),     # b1 slice
                pl.BlockSpec((th, dim), lambda i, h: (h, 0)),   # W2 hidden-block
                pl.BlockSpec((1, dim), lambda i, h: (0, 0)),    # b2
            ],
            out_specs=pl.BlockSpec((tm, dim), lambda i, h: (i, 0)),
            scratch_shapes=[pltpu.VMEM((tm, dim), jnp.float32)],
        )
        kernel = _ffn_kernel_blocked
        dim_sem = ("parallel", "arbitrary")

    out = pl.pallas_call(
        kernel,
        out_shape=jax.ShapeDtypeStruct((m_pad, dim), out_dtype),
        grid_spec=grid_spec,
        compiler_params=pltpu.CompilerParams(
            dimension_semantics=dim_sem,
            vmem_limit_bytes=vmem_limit,
        ),
    )(x2d, w1c, b1_2d, w2c, b2_2d)

    return out[:m].reshape(batch, seq, dim)


def _reference(x, w1, b1, w2, b2):
    h = jnp.einsum("bsd,dh->bsh", x.astype(jnp.float32), w1.astype(jnp.float32)) + b1
    h = 0.5 * h * (1.0 + lax.erf(h * _INV_SQRT2))
    y = jnp.einsum("bsh,hd->bsd", h, w2.astype(jnp.float32)) + b2
    return y.astype(x.dtype)


def _make_params(key, dim, hidden):
    kw1, kb1, kw2, kb2 = jax.random.split(key, 4)
    bound1 = 1.0 / jnp.sqrt(dim)
    w1 = jax.random.uniform(kw1, (dim, hidden), minval=-bound1, maxval=bound1, dtype=jnp.float32)
    b1 = jax.random.uniform(kb1, (hidden,), minval=-bound1, maxval=bound1, dtype=jnp.float32)
    bound2 = 1.0 / jnp.sqrt(hidden)
    w2 = jax.random.uniform(kw2, (hidden, dim), minval=-bound2, maxval=bound2, dtype=jnp.float32)
    b2 = jax.random.uniform(kb2, (dim,), minval=-bound2, maxval=bound2, dtype=jnp.float32)
    return w1, b1, w2, b2


if __name__ == "__main__":
    key = jax.random.PRNGKey(0)
    k_small, k_blk, kx1, kx2 = jax.random.split(key, 4)

    # --- Small shape consistent with the module (single-hidden-block fast path) ---
    batch, seq, dim, hidden = 2, 8, 32, 64
    x = jax.random.normal(kx1, (batch, seq, dim), dtype=jnp.float32)
    w1, b1, w2, b2 = _make_params(k_small, dim, hidden)
    ref = _reference(x, w1, b1, w2, b2)

    out_bf16 = jax.block_until_ready(feed_forward(x, w1, b1, w2, b2, use_bf16=True))
    assert out_bf16.shape == (batch, seq, dim)
    assert jnp.allclose(out_bf16, ref, atol=5e-2, rtol=5e-2), "bf16 path mismatch vs reference"

    out_f32 = jax.block_until_ready(feed_forward(x, w1, b1, w2, b2, use_bf16=False))
    assert jnp.allclose(out_f32, ref, atol=1e-5, rtol=1e-5), "f32 path mismatch vs reference"

    # --- Slightly larger shape exercising the blocked-hidden accumulate path ---
    b2_, s2_, d2_, h2_ = 2, 64, 128, 256
    x2 = jax.random.normal(kx2, (b2_, s2_, d2_), dtype=jnp.float32)
    w1b, b1b, w2b, b2b = _make_params(k_blk, d2_, h2_)
    ref2 = _reference(x2, w1b, b1b, w2b, b2b)

    out_blk = jax.block_until_ready(
        feed_forward(x2, w1b, b1b, w2b, b2b, tile_h=128, use_bf16=False))
    assert out_blk.shape == (b2_, s2_, d2_)
    assert jnp.allclose(out_blk, ref2, atol=1e-4, rtol=1e-4), "blocked-hidden path mismatch"

    print("KERNEL_OK")
</pallas_src>

<mosaic_0001>
module attributes {stable_mosaic.version = 11 : i64} {
  func.func @_ffn_kernel_single(%arg0: i32, %arg1: memref<16x32xbf16, #tpu.memory_space<vmem>>, %arg2: memref<32x64xbf16, #tpu.memory_space<vmem>>, %arg3: memref<1x64xf32, #tpu.memory_space<vmem>>, %arg4: memref<64x32xbf16, #tpu.memory_space<vmem>>, %arg5: memref<1x32xf32, #tpu.memory_space<vmem>>, %arg6: memref<16x32xf32, #tpu.memory_space<vmem>>) attributes {dimension_semantics = [#tpu.dimension_semantics<parallel>], iteration_bounds = array<i64: 1>, scalar_prefetch = 0 : i64, scratch_operands = 0 : i64, tpu.core_type = #tpu.core_type<tc>, window_params = [{transform_indices = @transform_0, window_bounds = array<i64: 16, 32>}, {pipeline_mode = #tpu.pipeline_mode<synchronous>, transform_indices = @transform_1, window_bounds = array<i64: 32, 64>}, {pipeline_mode = #tpu.pipeline_mode<synchronous>, transform_indices = @transform_2, window_bounds = array<i64: 1, 64>}, {pipeline_mode = #tpu.pipeline_mode<synchronous>, transform_indices = @transform_3, window_bounds = array<i64: 64, 32>}, {pipeline_mode = #tpu.pipeline_mode<synchronous>, transform_indices = @transform_4, window_bounds = array<i64: 1, 32>}, {transform_indices = @transform_5, window_bounds = array<i64: 16, 32>}]} {
    %c0 = arith.constant 0 : index
    %c0_0 = arith.constant 0 : index
    %0 = vector.load %arg1[%c0, %c0_0] : memref<16x32xbf16, #tpu.memory_space<vmem>>, vector<16x32xbf16>
    %c0_1 = arith.constant 0 : index
    %c0_2 = arith.constant 0 : index
    %1 = vector.load %arg2[%c0_1, %c0_2] : memref<32x64xbf16, #tpu.memory_space<vmem>>, vector<32x64xbf16>
    %cst = arith.constant dense<0.000000e+00> : vector<16x64xf32>
    %2 = tpu.matmul %0, %1, %cst {dimension_numbers = #tpu.dot_dimension_numbers<[1], [0], [0], [1], [0, 0, 1, 1], [], []>} : vector<16x32xbf16>, vector<32x64xbf16>, vector<16x64xf32> -> vector<16x64xf32>
    %c0_3 = arith.constant 0 : index
    %c0_4 = arith.constant 0 : index
    %3 = vector.load %arg3[%c0_3, %c0_4] : memref<1x64xf32, #tpu.memory_space<vmem>>, vector<1x64xf32>
    %4 = vector.broadcast %3 : vector<1x64xf32> to vector<16x64xf32>
    %5 = arith.addf %2, %4 : vector<16x64xf32>
    %cst_5 = arith.constant 5.000000e-01 : f32
    %6 = vector.broadcast %cst_5 : f32 to vector<16x64xf32>
    %7 = arith.mulf %6, %5 : vector<16x64xf32>
    %cst_6 = arith.constant 0.707106769 : f32
    %8 = vector.broadcast %cst_6 : f32 to vector<16x64xf32>
    %9 = arith.mulf %5, %8 : vector<16x64xf32>
    %10 = math.erf %9 : vector<16x64xf32>
    %cst_7 = arith.constant 1.000000e+00 : f32
    %11 = vector.broadcast %cst_7 : f32 to vector<16x64xf32>
    %12 = arith.addf %11, %10 : vector<16x64xf32>
    %13 = arith.mulf %7, %12 : vector<16x64xf32>
    %14 = arith.truncf %13 : vector<16x64xf32> to vector<16x64xbf16>
    %c0_8 = arith.constant 0 : index
    %c0_9 = arith.constant 0 : index
    %15 = vector.load %arg4[%c0_8, %c0_9] : memref<64x32xbf16, #tpu.memory_space<vmem>>, vector<64x32xbf16>
    %cst_10 = arith.constant dense<0.000000e+00> : vector<16x32xf32>
    %16 = tpu.matmul %14, %15, %cst_10 {dimension_numbers = #tpu.dot_dimension_numbers<[1], [0], [0], [1], [0, 0, 1, 1], [], []>} : vector<16x64xbf16>, vector<64x32xbf16>, vector<16x32xf32> -> vector<16x32xf32>
    %c0_11 = arith.constant 0 : index
    %c0_12 = arith.constant 0 : index
    %17 = vector.load %arg5[%c0_11, %c0_12] : memref<1x32xf32, #tpu.memory_space<vmem>>, vector<1x32xf32>
    %18 = vector.broadcast %17 : vector<1x32xf32> to vector<16x32xf32>
    %19 = arith.addf %16, %18 : vector<16x32xf32>
    %c0_13 = arith.constant 0 : index
    %c0_14 = arith.constant 0 : index
    %20 = vector.load %arg6[%c0_13, %c0_14] : memref<16x32xf32, #tpu.memory_space<vmem>>, vector<16x32xf32>
    tpu.vector_store %arg6[%c0_13, %c0_14], %19 {strides = array<i32>} : memref<16x32xf32, #tpu.memory_space<vmem>>, vector<16x32xf32>,
    return
  }
  func.func @transform_0(%arg0: i32) -> (i32, i32) {
    %c0_i32 = arith.constant 0 : i32
    %c0_i32_0 = arith.constant 0 : i32
    return %arg0, %c0_i32 : i32, i32
  }
  func.func @transform_1(%arg0: i32) -> (i32, i32) {
    %c0_i32 = arith.constant 0 : i32
    %c0_i32_0 = arith.constant 0 : i32
    %c0_i32_1 = arith.constant 0 : i32
    return %c0_i32, %c0_i32_0 : i32, i32
  }
  func.func @transform_2(%arg0: i32) -> (i32, i32) {
    %c0_i32 = arith.constant 0 : i32
    %c0_i32_0 = arith.constant 0 : i32
    %c0_i32_1 = arith.constant 0 : i32
    return %c0_i32, %c0_i32_0 : i32, i32
  }
  func.func @transform_3(%arg0: i32) -> (i32, i32) {
    %c0_i32 = arith.constant 0 : i32
    %c0_i32_0 = arith.constant 0 : i32
    %c0_i32_1 = arith.constant 0 : i32
    return %c0_i32, %c0_i32_0 : i32, i32
  }
  func.func @transform_4(%arg0: i32) -> (i32, i32) {
    %c0_i32 = arith.constant 0 : i32
    %c0_i32_0 = arith.constant 0 : i32
    %c0_i32_1 = arith.constant 0 : i32
    return %c0_i32, %c0_i32_0 : i32, i32
  }
  func.func @transform_5(%arg0: i32) -> (i32, i32) {
    %c0_i32 = arith.constant 0 : i32
    %c0_i32_0 = arith.constant 0 : i32
    return %arg0, %c0_i32 : i32, i32
  }
}

</mosaic_0001>

<bundles_post_ra>
// kernel: feed_forward.1
= control target key start
LH: loop header
LB: loop body
LE: loop exit
PB: predicated region body
PF: predicated region fallthrough
CT: control target
= control target key end

     0   :  { %v289_v1 = vmov 0.0   ;;  %vm290_vm0 = vmmov 0   ;;  %vm52_vm1 = vcmask 261120   ;;  %s366_s0 = inlined_call_operand.vmem [shape: bf16[16,32], index: 0, kind: input, shape index: {}]   ;;  %s367_s1 = inlined_call_operand.vmem [shape: bf16[32,64], index: 1, kind: input, shape index: {}]   ;;  %s368_s2 = inlined_call_operand.vmem [shape: f32[1,64], index: 2, kind: input, shape index: {}]   ;;  %s369_s3 = inlined_call_operand.vmem [shape: bf16[64,32], index: 3, kind: input, shape index: {}]   ;;  %s370_s4 = inlined_call_operand.vmem [shape: f32[1,32], index: 4, kind: input, shape index: {}]   ;;  %s371_s5 = inlined_call_operand.hbm [shape: f32[16,32], index: 5, kind: output, shape index: {}]  }
   0x1   :  { %v254_v0 = vld [vmem:[%s367_s1] sm:$0xff]   ;;  %229 = vmatprep.subr.bf16.mxu0 %v289_v1  ;;  %237 = vmatprep.subr.bf16.mxu1 %v289_v1  ;;  %v255_v2 = vld [vmem:[%s367_s1 + $0x8] sm:$0xff]  }
   0x2   :  { %230 = vmatpush3.bf16.msra.mxu0 %v254_v0  ;;  %233 = vmatprep.mubr.msk.bf16.mxu0 %vm290_vm0, %v289_v1  ;;  %v256_v3 = vld [vmem:[%s366_s0] sm:$0xff]  }
   0x3   :  { %231 = vmatprep.subr.bf16.mxu0 %v289_v1  ;;  %245 = vmatprep.mubr.msk.bf16.mxu1 %vm290_vm0, %v289_v1 }
   0x6   :  { %232 = vmatpush3.bf16.msra.mxu0 %v255_v2 }
   0x7   :  { %10 = vsyncpa [#allocation3], 0  ;;  %v257_v4 = vld [vmem:[%s369_s3] sm:$0xff]   ;;  %v258_v5 = vld [vmem:[%s369_s3 + $0x8] sm:$0xff]   ;;  %vm147_vm2 = vcmask 523264   ;;  %s291_s7 = smov [#allocation2]  }
   0x8   :  { %238 = vmatpush3.bf16.msra.mxu1 %v257_v4  ;;  %v259_v6 = vld [vmem:[%s369_s3 + $0x10] sm:$0xff]   ;;  %v260_v7 = vld [vmem:[%s369_s3 + $0x18] sm:$0xff]   ;;  %v210_v8 = vld [vmem:[%s368_s2] ss:$0 sm:$0xff]  ;;  %s199_s8 = sshll.u32 %s291_s7, 4  ;;  %s200_s8 = int_to_ptr.vmem [resolvable:$true] %s199_s8 }
   0x9   :  { %234 = vmatmul.mubr.msk.bf16.vlgmr.msra.gmra.mrb[0].mxu0 %vm52_vm1, %v256_v3  ;;  %239 = vmatprep.subr.bf16.mxu1 %v289_v1  ;;  %v215_v26 = vld [vmem:[%s370_s4] ss:$0 sm:$0xff]  ;;  %s265_s9 = scalar_lea.vmem %s200_s8, 256  ;;  %p270_p1 = scmp.lt.s32.totalorder %s200_s8, %s200_s8 }
   0xa   :  { %p266_p0 = scmp.ne.s32.totalorder %s200_s8, %s265_s9  ;;  %p271_p2 = scmp.lt.s32.totalorder %s265_s9, %s265_s9 }
   0xc   :  { %240 = vmatpush3.bf16.msra.mxu1 %v258_v5  ;;  %p272_p3 = por %p271_p2, %p270_p1 }
   0xd   :  { %241 = vmatprep.subr.bf16.mxu1 %v289_v1 }
   0xe   :  { %p273_p4 = pnand %p272_p3, %p266_p0 }
  0x10   :  { %242 = vmatpush3.bf16.msra.mxu1 %v259_v6 }
  0x11   :  { %243 = vmatprep.subr.bf16.mxu1 %v289_v1 }
  0x14   :  { %244 = vmatpush3.bf16.msra.mxu1 %v260_v7 }
  0xdc   :  { %v90_v9 = vpop.f32.mrb[0].mxu0 }
  0xdd   :  { %v91_v10 = vadd.f32 %v210_v8, %v90_v9  ;;  %v235_v11 = vpop.f32.mrb[1].mxu0 }
  0xde   :  { %v93_v12 = vpop.f32.mrb[2].mxu0 }
  0xdf   :  { %v99_v13 = vmul.f32 0.70710677, %v91_v10  ;;  %v94_v14 = vadd.f32 %v210_v8, %v93_v12  ;;  %v236_v15 = vpop.f32.mrb[3].mxu0  ;;  %v97_v20 = vmul.f32 0.5, %v91_v10 }
  0xe1   :  { %261 = verf.f32 %v99_v13  ;;  %v100_v16 = vmul.f32 0.70710677, %v94_v14  ;;  %v98_v21 = vmul.f32 0.5, %v94_v14 }
  0xe3   :  { %263 = verf.f32 %v100_v16 }
  0xeb   :  { %v262_v17 = vpop.eup %261 }
  0xec   :  { %v103_v18 = vadd.f32 1.0, %v262_v17 }
  0xed   :  { %v264_v19 = vpop.eup %263 }
  0xee   :  { %v104_v22 = vadd.f32 1.0, %v264_v19  ;;  %v105_v23 = vmul.f32 %v103_v18, %v97_v20 }
  0xf0   :  { %v106_v24 = vmul.f32 %v104_v22, %v98_v21 }
  0xf2   :  { %v107_v25 = vpack.c.bf16 %v106_v24, %v105_v23 }
  0xf4   :  { %246 = vmatmul.mubr.msk.bf16.vlgmr.msra.gmra.mrb[0].mxu1 %vm147_vm2, %v107_v25 }
 0x1c7   :  { %v185_v27 = vpop.f32.mrb[0].mxu1 }
 0x1c8   :  { %v186_v28 = vadd.f32 %v215_v26, %v185_v27  ;;  %v247_v29 = vpop.f32.mrb[1].mxu1 }
 0x1c9   :  { %v188_v30 = vpop.f32.mrb[2].mxu1 }
 0x1ca   :  { %192 = vst.msk [vmem:[#allocation2] sm:$0xff] %vm52_vm1, %v186_v28  ;;  %v189_v31 = vadd.f32 %v215_v26, %v188_v30  ;;  %v248_v32 = vpop.f32.mrb[3].mxu1 }
 0x1cc   :  { %193 = vst.msk [vmem:[#allocation2 + $0x8] sm:$0xff] %vm52_vm1, %v189_v31 }
 0x1cd   :  { %276 = shalt.err (!%p273_p4)
}
 0x1ce   :  { %s277_s11 = scalar_lea.hbm %s371_s5, 256 }
 0x1cf   :  { %p278_p5 = scmp.ne.s32.totalorder %s371_s5, %s277_s11  ;;  %p281_p6 = scmp.lt.u32.totalorder %s277_s11, %s371_s5 }
 0x1d1   :  { %p283_p7 = pnand %p281_p6, %p278_p5 }
 0x1d3   :  { %286 = shalt.err (!%p283_p7)
}
 0x1d4   :  { %s292_s16 = smov 128   ;;  %s293_s17 = smov 8  }
 0x1d5   :  { %205 = dma.vmem_to_hbm [thread:$0]  %s200_s8, 256, %s371_s5, [#allocation3], %s292_s16, %s292_s16, %s293_s17  }
 0x1d6   :  { %287 = dma.done.wait [#allocation3], 256  }
 0x1d7   :  { %288 = vsyncadd [#allocation3], 4294967040 }
 0x1d8   :  { %209 = vsyncpa [#allocation3], 1 }

</bundles_post_ra>
